<compile_context>
chip_gen: v7x
topology: tpu7x:2x2x1
jax: 0.10.0
libtpu: 0.0.40
codegen_flags: <defaults>
</compile_context>

<pallas_src>
import numpy as np
import jax
import jax.numpy as jnp
from jax import lax
from jax.experimental import pallas as pl
from jax.experimental.pallas import tpu as pltpu

# ---------------------------------------------------------------------------
# Vocabulary exactly as in the PyTorch script
# ---------------------------------------------------------------------------
EOS_token = 1
SOS_token = 0
dataset = [('big', 'large'), ('small', 'tiny'), ('happy', 'joyful'), ('sad', 'unhappy'),
           ('fast', 'quick'), ('slow', 'sluggish'), ('bright', 'luminous'), ('dark', 'dim'),
           ('hard', 'difficult'), ('easy', 'simple'), ('hot', 'warm'), ('cold', 'chilly'),
           ('old', 'ancient'), ('new', 'recent'), ('good', 'excellent'), ('bad', 'poor'),
           ('strong', 'powerful'), ('weak', 'feeble'), ('tall', 'high'), ('short', 'brief'),
           ('fat', 'obese'), ('thin', 'slender'), ('rich', 'wealthy'), ('poor', 'needy'),
           ('smart', 'intelligent'), ('dumb', 'stupid'), ('happy', 'content'), ('sad', 'mournful'),
           ('beautiful', 'attractive'), ('ugly', 'unattractive'), ('expensive', 'costly'),
           ('cheap', 'inexpensive'), ('empty', 'vacant'), ('full', 'filled'),
           ('noisy', 'loud'), ('quiet', 'silent')]
char_to_index = {'SOS': SOS_token, 'EOS': EOS_token,
                 **{c: i + 2 for i, c in enumerate(
                     sorted(list(set(''.join([w for p in dataset for w in p])))))}}

INPUT_SIZE = len(char_to_index)   # vocabulary size
HIDDEN_SIZE = 12


# ---------------------------------------------------------------------------
# Pallas kernel: full LSTM recurrence over the token sequence in one call.
#   - token ids arrive via scalar prefetch (SMEM)
#   - embedding table / weights sit resident in VMEM
#   - the recurrence is an in-kernel (fully unrolled) fori_loop
# ---------------------------------------------------------------------------
def encoder_lstm_kernel(tok_ref,     # SMEM prefetch: (seq_len,) int32 token ids
                        emb_ref,     # (V, H)   embedding table
                        wx_ref,      # (H, 4H)  pre-transposed input weights, gate order [i,f,g,o]
                        wh_ref,      # (H, 4H)  pre-transposed hidden weights, gate order [i,f,g,o]
                        b_ref,       # (1, 4H)  fused bias (b_ih + b_hh)
                        h0_ref,      # (1, H)   initial hidden state
                        c0_ref,      # (1, H)   initial cell state
                        hc_ref):     # (2, H)   output: row 0 = h_n, row 1 = c_n
    H = h0_ref.shape[1]
    seq_len = tok_ref.shape[0]

    wx = wx_ref[...]
    wh = wh_ref[...]
    b = b_ref[...]

    def step(t, carry):
        h, c = carry
        # Embedding gather: dynamic row read driven by the SMEM token id.
        x = emb_ref[pl.ds(tok_ref[t], 1), :]                       # (1, H)
        pre = (jnp.dot(x, wx, preferred_element_type=jnp.float32)
               + jnp.dot(h, wh, preferred_element_type=jnp.float32)
               + b)                                                # (1, 4H)
        i_g = jax.nn.sigmoid(pre[:, 0 * H:1 * H])
        f_g = jax.nn.sigmoid(pre[:, 1 * H:2 * H])
        g_g = jnp.tanh(pre[:, 2 * H:3 * H])
        o_g = jax.nn.sigmoid(pre[:, 3 * H:4 * H])
        c_new = f_g * c + i_g * g_g
        h_new = o_g * jnp.tanh(c_new)
        return h_new, c_new

    h_n, c_n = lax.fori_loop(0, seq_len, step,
                             (h0_ref[...], c0_ref[...]), unroll=True)
    hc_ref[0:1, :] = h_n
    hc_ref[1:2, :] = c_n


# ---------------------------------------------------------------------------
# Host-side weight repack (done once, outside the hot path)
# ---------------------------------------------------------------------------
def pack_params(emb, w_ih, w_hh, b):
    """w_ih/w_hh: (4, H, H) gate-major [i,f,g,o]; b: (4, 1, H) = b_ih + b_hh.
    Returns (emb, W_x (H,4H), W_h (H,4H), b_fused (1,4H)) such that
    x @ W_x + h @ W_h + b_fused == concat_g(x @ w_ih[g].T + h @ w_hh[g].T + b[g])."""
    H = emb.shape[1]
    w_x = jnp.transpose(w_ih, (2, 0, 1)).reshape(H, 4 * H)   # [k, g*H + j] = w_ih[g, j, k]
    w_h = jnp.transpose(w_hh, (2, 0, 1)).reshape(H, 4 * H)
    b_fused = b.reshape(1, 4 * H)
    return emb, w_x, w_h, b_fused


# ---------------------------------------------------------------------------
# Wrappers
# ---------------------------------------------------------------------------
def encode_sequence(packed, tokens, hidden):
    """Run the LSTM over a whole int32 token sequence in ONE pallas_call.

    tokens: (seq_len,) int32
    hidden: (h0, c0) each (1, 1, H)
    returns (output (1,1,H) == last h, (h_n (1,1,H), c_n (1,1,H)))
    """
    emb, wx, wh, b = packed
    h0, c0 = hidden
    V, H = emb.shape

    grid_spec = pltpu.PrefetchScalarGridSpec(
        num_scalar_prefetch=1,          # token ids -> SMEM
        grid=(1,),                      # single step; recurrence lives in the kernel
        in_specs=[
            pl.BlockSpec((V, H), lambda i, tok: (0, 0)),
            pl.BlockSpec((H, 4 * H), lambda i, tok: (0, 0)),
            pl.BlockSpec((H, 4 * H), lambda i, tok: (0, 0)),
            pl.BlockSpec((1, 4 * H), lambda i, tok: (0, 0)),
            pl.BlockSpec((1, H), lambda i, tok: (0, 0)),
            pl.BlockSpec((1, H), lambda i, tok: (0, 0)),
        ],
        out_specs=pl.BlockSpec((2, H), lambda i, tok: (0, 0)),
    )

    hc = pl.pallas_call(
        encoder_lstm_kernel,
        grid_spec=grid_spec,
        out_shape=jax.ShapeDtypeStruct((2, H), jnp.float32),
        compiler_params=pltpu.CompilerParams(
            dimension_semantics=("arbitrary",)),
    )(tokens.astype(jnp.int32),
      emb, wx, wh, b,
      h0.reshape(1, H), c0.reshape(1, H))

    h_n = hc[0:1, :].reshape(1, 1, H)
    c_n = hc[1:2, :].reshape(1, 1, H)
    return h_n, (h_n, c_n)


def encoder_forward(packed, token_id, hidden):
    """Mirrors Encoder.forward(input, hidden): a single token step."""
    return encode_sequence(packed, token_id.reshape(1), hidden)


# ---------------------------------------------------------------------------
# Pure-JAX references (same math) for correctness checks
# ---------------------------------------------------------------------------
def encoder_forward_ref(params, token_id, hidden):
    emb, w_ih, w_hh, b = params
    h, c = hidden[0].reshape(1, -1), hidden[1].reshape(1, -1)
    x = emb[token_id[0]].reshape(1, -1)
    gates = [x @ w_ih[k].T + h @ w_hh[k].T + b[k] for k in range(4)]
    i_g = jax.nn.sigmoid(gates[0]); f_g = jax.nn.sigmoid(gates[1])
    g_g = jnp.tanh(gates[2]); o_g = jax.nn.sigmoid(gates[3])
    c_new = f_g * c + i_g * g_g
    h_new = o_g * jnp.tanh(c_new)
    H = h_new.shape[-1]
    return h_new.reshape(1, 1, H), (h_new.reshape(1, 1, H), c_new.reshape(1, 1, H))


def encode_sequence_ref(params, tokens, hidden):
    out = None
    for t in range(tokens.shape[0]):
        out, hidden = encoder_forward_ref(params, tokens[t:t + 1], hidden)
    return out, hidden


# ---------------------------------------------------------------------------
# Deterministic parameter initialization (shapes match nn.Embedding / nn.LSTM)
# ---------------------------------------------------------------------------
def init_params(key, input_size, hidden_size):
    k_emb, k_wih, k_whh, k_bih, k_bhh = jax.random.split(key, 5)
    bound = 1.0 / np.sqrt(hidden_size)
    emb = jax.random.normal(k_emb, (input_size, hidden_size), jnp.float32)
    w_ih = jax.random.uniform(k_wih, (4, hidden_size, hidden_size), jnp.float32, -bound, bound)
    w_hh = jax.random.uniform(k_whh, (4, hidden_size, hidden_size), jnp.float32, -bound, bound)
    b_ih = jax.random.uniform(k_bih, (4, 1, hidden_size), jnp.float32, -bound, bound)
    b_hh = jax.random.uniform(k_bhh, (4, 1, hidden_size), jnp.float32, -bound, bound)
    b = b_ih + b_hh   # biases always appear summed in the LSTM cell equations
    return emb, w_ih, w_hh, b


if __name__ == "__main__":
    key = jax.random.PRNGKey(0)
    raw_params = init_params(key, INPUT_SIZE, HIDDEN_SIZE)
    packed = pack_params(*raw_params)

    h0 = jnp.zeros((1, 1, HIDDEN_SIZE), jnp.float32)
    c0 = jnp.zeros((1, 1, HIDDEN_SIZE), jnp.float32)

    # --- 1) Single-token step: exact Encoder.forward semantics -------------
    token_id = jnp.array([char_to_index['b']], dtype=jnp.int32)
    out, (h_n, c_n) = encoder_forward(packed, token_id, (h0, c0))
    jax.block_until_ready((out, h_n, c_n))

    out_r, (h_r, c_r) = encoder_forward_ref(raw_params, token_id, (h0, c0))
    np.testing.assert_allclose(np.asarray(out), np.asarray(out_r), rtol=1e-5, atol=1e-5)
    np.testing.assert_allclose(np.asarray(h_n), np.asarray(h_r), rtol=1e-5, atol=1e-5)
    np.testing.assert_allclose(np.asarray(c_n), np.asarray(c_r), rtol=1e-5, atol=1e-5)

    # --- 2) Whole word encoded in ONE pallas_call (fused sequence path) ----
    word = 'bright'
    tokens = jnp.array([char_to_index[c] for c in word] + [EOS_token], dtype=jnp.int32)
    out_s, (h_s, c_s) = encode_sequence(packed, tokens, (h0, c0))
    jax.block_until_ready((out_s, h_s, c_s))

    out_sr, (h_sr, c_sr) = encode_sequence_ref(raw_params, tokens, (h0, c0))
    np.testing.assert_allclose(np.asarray(out_s), np.asarray(out_sr), rtol=1e-5, atol=1e-5)
    np.testing.assert_allclose(np.asarray(h_s), np.asarray(h_sr), rtol=1e-5, atol=1e-5)
    np.testing.assert_allclose(np.asarray(c_s), np.asarray(c_sr), rtol=1e-5, atol=1e-5)

    print("KERNEL_OK")
</pallas_src>

<mosaic_0001>
module attributes {stable_mosaic.version = 11 : i64} {
  func.func @encoder_lstm_kernel(%arg0: i32, %arg1: memref<1xi32, #tpu.memory_space<smem>>, %arg2: memref<27x12xf32, #tpu.memory_space<vmem>>, %arg3: memref<12x48xf32, #tpu.memory_space<vmem>>, %arg4: memref<12x48xf32, #tpu.memory_space<vmem>>, %arg5: memref<1x48xf32, #tpu.memory_space<vmem>>, %arg6: memref<1x12xf32, #tpu.memory_space<vmem>>, %arg7: memref<1x12xf32, #tpu.memory_space<vmem>>, %arg8: memref<2x12xf32, #tpu.memory_space<vmem>>) attributes {dimension_semantics = [#tpu.dimension_semantics<arbitrary>], iteration_bounds = array<i64: 1>, scalar_prefetch = 1 : i64, scratch_operands = 0 : i64, tpu.core_type = #tpu.core_type<tc>, window_params = [{pipeline_mode = #tpu.pipeline_mode<synchronous>, transform_indices = @transform_0, window_bounds = array<i64: 27, 12>}, {pipeline_mode = #tpu.pipeline_mode<synchronous>, transform_indices = @transform_1, window_bounds = array<i64: 12, 48>}, {pipeline_mode = #tpu.pipeline_mode<synchronous>, transform_indices = @transform_2, window_bounds = array<i64: 12, 48>}, {pipeline_mode = #tpu.pipeline_mode<synchronous>, transform_indices = @transform_3, window_bounds = array<i64: 1, 48>}, {pipeline_mode = #tpu.pipeline_mode<synchronous>, transform_indices = @transform_4, window_bounds = array<i64: 1, 12>}, {pipeline_mode = #tpu.pipeline_mode<synchronous>, transform_indices = @transform_5, window_bounds = array<i64: 1, 12>}, {pipeline_mode = #tpu.pipeline_mode<synchronous>, transform_indices = @transform_6, window_bounds = array<i64: 2, 12>}]} {
    %c0 = arith.constant 0 : index
    %c0_0 = arith.constant 0 : index
    %0 = vector.load %arg3[%c0, %c0_0] : memref<12x48xf32, #tpu.memory_space<vmem>>, vector<12x48xf32>
    %c0_1 = arith.constant 0 : index
    %c0_2 = arith.constant 0 : index
    %1 = vector.load %arg4[%c0_1, %c0_2] : memref<12x48xf32, #tpu.memory_space<vmem>>, vector<12x48xf32>
    %c0_3 = arith.constant 0 : index
    %c0_4 = arith.constant 0 : index
    %2 = vector.load %arg5[%c0_3, %c0_4] : memref<1x48xf32, #tpu.memory_space<vmem>>, vector<1x48xf32>
    %c0_5 = arith.constant 0 : index
    %c0_6 = arith.constant 0 : index
    %3 = vector.load %arg6[%c0_5, %c0_6] : memref<1x12xf32, #tpu.memory_space<vmem>>, vector<1x12xf32>
    %c0_7 = arith.constant 0 : index
    %c0_8 = arith.constant 0 : index
    %4 = vector.load %arg7[%c0_7, %c0_8] : memref<1x12xf32, #tpu.memory_space<vmem>>, vector<1x12xf32>
    %c0_i32 = arith.constant 0 : i32
    %5 = arith.index_cast %c0_i32 : i32 to index
    %6 = memref.load %arg1[%5] : memref<1xi32, #tpu.memory_space<smem>>
    %7 = arith.index_cast %6 : i32 to index
    %c0_9 = arith.constant 0 : index
    %8 = vector.load %arg2[%7, %c0_9] : memref<27x12xf32, #tpu.memory_space<vmem>>, vector<1x12xf32>
    %cst = arith.constant dense<0.000000e+00> : vector<1x48xf32>
    %9 = tpu.matmul %8, %0, %cst {dimension_numbers = #tpu.dot_dimension_numbers<[1], [0], [0], [1], [0, 0, 1, 1], [], []>} : vector<1x12xf32>, vector<12x48xf32>, vector<1x48xf32> -> vector<1x48xf32>
    %cst_10 = arith.constant dense<0.000000e+00> : vector<1x48xf32>
    %10 = tpu.matmul %3, %1, %cst_10 {dimension_numbers = #tpu.dot_dimension_numbers<[1], [0], [0], [1], [0, 0, 1, 1], [], []>} : vector<1x12xf32>, vector<12x48xf32>, vector<1x48xf32> -> vector<1x48xf32>
    %11 = arith.addf %9, %10 : vector<1x48xf32>
    %12 = arith.addf %11, %2 : vector<1x48xf32>
    %13 = vector.extract_strided_slice %12 {offsets = [0, 0], sizes = [1, 12], strides = [1, 1]} : vector<1x48xf32> to vector<1x12xf32>
    %14 = arith.negf %13 : vector<1x12xf32>
    %15 = math.exp %14 : vector<1x12xf32>
    %cst_11 = arith.constant 1.000000e+00 : f32
    %16 = vector.broadcast %cst_11 : f32 to vector<1x12xf32>
    %17 = arith.addf %16, %15 : vector<1x12xf32>
    %18 = arith.divf %16, %17 : vector<1x12xf32>
    %19 = vector.extract_strided_slice %12 {offsets = [0, 12], sizes = [1, 12], strides = [1, 1]} : vector<1x48xf32> to vector<1x12xf32>
    %20 = arith.negf %19 : vector<1x12xf32>
    %21 = math.exp %20 : vector<1x12xf32>
    %cst_12 = arith.constant 1.000000e+00 : f32
    %22 = vector.broadcast %cst_12 : f32 to vector<1x12xf32>
    %23 = arith.addf %22, %21 : vector<1x12xf32>
    %24 = arith.divf %22, %23 : vector<1x12xf32>
    %25 = vector.extract_strided_slice %12 {offsets = [0, 24], sizes = [1, 12], strides = [1, 1]} : vector<1x48xf32> to vector<1x12xf32>
    %26 = math.tanh %25 : vector<1x12xf32>
    %27 = vector.extract_strided_slice %12 {offsets = [0, 36], sizes = [1, 12], strides = [1, 1]} : vector<1x48xf32> to vector<1x12xf32>
    %28 = arith.negf %27 : vector<1x12xf32>
    %29 = math.exp %28 : vector<1x12xf32>
    %cst_13 = arith.constant 1.000000e+00 : f32
    %30 = vector.broadcast %cst_13 : f32 to vector<1x12xf32>
    %31 = arith.addf %30, %29 : vector<1x12xf32>
    %32 = arith.divf %30, %31 : vector<1x12xf32>
    %33 = arith.mulf %24, %4 : vector<1x12xf32>
    %34 = arith.mulf %18, %26 : vector<1x12xf32>
    %35 = arith.addf %33, %34 : vector<1x12xf32>
    %36 = math.tanh %35 : vector<1x12xf32>
    %37 = arith.mulf %32, %36 : vector<1x12xf32>
    %c1_i32 = arith.constant 1 : i32
    %c0_14 = arith.constant 0 : index
    %c0_15 = arith.constant 0 : index
    %38 = vector.load %arg8[%c0_14, %c0_15] : memref<2x12xf32, #tpu.memory_space<vmem>>, vector<1x12xf32>
    tpu.vector_store %arg8[%c0_14, %c0_15], %37 {strides = array<i32>} : memref<2x12xf32, #tpu.memory_space<vmem>>, vector<1x12xf32>,
    %c1 = arith.constant 1 : index
    %c0_16 = arith.constant 0 : index
    %39 = vector.load %arg8[%c1, %c0_16] : memref<2x12xf32, #tpu.memory_space<vmem>>, vector<1x12xf32>
    tpu.vector_store %arg8[%c1, %c0_16], %35 {strides = array<i32>} : memref<2x12xf32, #tpu.memory_space<vmem>>, vector<1x12xf32>,
    return
  }
  func.func @transform_0(%arg0: i32, %arg1: memref<1xi32, #tpu.memory_space<smem>>) -> (i32, i32) {
    %c0_i32 = arith.constant 0 : i32
    %c0_i32_0 = arith.constant 0 : i32
    %c0_i32_1 = arith.constant 0 : i32
    return %c0_i32, %c0_i32_0 : i32, i32
  }
  func.func @transform_1(%arg0: i32, %arg1: memref<1xi32, #tpu.memory_space<smem>>) -> (i32, i32) {
    %c0_i32 = arith.constant 0 : i32
    %c0_i32_0 = arith.constant 0 : i32
    %c0_i32_1 = arith.constant 0 : i32
    return %c0_i32, %c0_i32_0 : i32, i32
  }
  func.func @transform_2(%arg0: i32, %arg1: memref<1xi32, #tpu.memory_space<smem>>) -> (i32, i32) {
    %c0_i32 = arith.constant 0 : i32
    %c0_i32_0 = arith.constant 0 : i32
    %c0_i32_1 = arith.constant 0 : i32
    return %c0_i32, %c0_i32_0 : i32, i32
  }
  func.func @transform_3(%arg0: i32, %arg1: memref<1xi32, #tpu.memory_space<smem>>) -> (i32, i32) {
    %c0_i32 = arith.constant 0 : i32
    %c0_i32_0 = arith.constant 0 : i32
    %c0_i32_1 = arith.constant 0 : i32
    return %c0_i32, %c0_i32_0 : i32, i32
  }
  func.func @transform_4(%arg0: i32, %arg1: memref<1xi32, #tpu.memory_space<smem>>) -> (i32, i32) {
    %c0_i32 = arith.constant 0 : i32
    %c0_i32_0 = arith.constant 0 : i32
    %c0_i32_1 = arith.constant 0 : i32
    return %c0_i32, %c0_i32_0 : i32, i32
  }
  func.func @transform_5(%arg0: i32, %arg1: memref<1xi32, #tpu.memory_space<smem>>) -> (i32, i32) {
    %c0_i32 = arith.constant 0 : i32
    %c0_i32_0 = arith.constant 0 : i32
    %c0_i32_1 = arith.constant 0 : i32
    return %c0_i32, %c0_i32_0 : i32, i32
  }
  func.func @transform_6(%arg0: i32, %arg1: memref<1xi32, #tpu.memory_space<smem>>) -> (i32, i32) {
    %c0_i32 = arith.constant 0 : i32
    %c0_i32_0 = arith.constant 0 : i32
    %c0_i32_1 = arith.constant 0 : i32
    return %c0_i32, %c0_i32_0 : i32, i32
  }
}

</mosaic_0001>

<bundles_post_ra>
// kernel: tpu_custom_call.1
= control target key start
LH: loop header
LB: loop body
LE: loop exit
PB: predicated region body
PF: predicated region fallthrough
CT: control target
= control target key end

     0   :  { %vm40_vm0 = vcmask 1043456   ;;  %v325_v2 = vmov 0.0|0.0   ;;  %vm326_vm1 = vmmov 1   ;;  %vm327_vm3 = vmmov 0   ;;  %s414_s0 = inlined_call_operand.<no memory space> [shape: s32[1], index: 0, kind: input, shape index: {}]   ;;  %s415_s1 = inlined_call_operand.vmem [shape: f32[27,12], index: 1, kind: input, shape index: {}]   ;;  %s416_s2 = inlined_call_operand.vmem [shape: f32[12,48], index: 2, kind: input, shape index: {}]   ;;  %s417_s3 = inlined_call_operand.vmem [shape: f32[12,48], index: 3, kind: input, shape index: {}]   ;;  %s418_s4 = inlined_call_operand.vmem [shape: f32[1,48], index: 4, kind: input, shape index: {}]   ;;  %s419_s5 = inlined_call_operand.vmem [shape: f32[1,12], index: 5, kind: input, shape index: {}]   ;;  %s420_s6 = inlined_call_operand.vmem [shape: f32[1,12], index: 6, kind: input, shape index: {}]   ;;  %s421_s7 = inlined_call_operand.hbm [shape: f32[2,12], index: 7, kind: output, shape index: {}]  }
   0x1   :  { %v28_v0 = vld [vmem:[%s417_s3] sm:$0xff]  ;;  %v29_v1 = vld [vmem:[%s417_s3 + $0x8] sm:$0xf]  ;;  %275 = vmatprep.subr.bf16.mxu0 %v325_v2  ;;  %279 = vmatprep.subr.bf16.mxu1 %v325_v2  ;;  %vm277_vm2 = vmpackc.low %vm40_vm0, %vm326_vm1  ;;  %s34_s12 = scalar_lea.vmem %s415_s1, %s414_s0  ;;  %v328_v7 = vmov 0.0  }
   0x2   :  { %v276_v3 = vpack.c.bf16 %v29_v1, %v28_v0  ;;  %v26_v4 = vld [vmem:[%s416_s2] sm:$0xff]  ;;  %v27_v5 = vld [vmem:[%s416_s2 + $0x8] sm:$0xf]  ;;  %265 = vmatprep.mubr.msk.f32.mxu0 %vm327_vm3, %v328_v7  ;;  %272 = vmatprep.mubr.msk.f32.mxu1 %vm327_vm3, %v328_v7 }
   0x3   :  { %v280_v6 = vpack.c.bf16 %v27_v5, %v26_v4 }
   0x4   :  { %13 = vsyncpa [#allocation5], 0  ;;  %278 = vmatpush3.bf16.msk.msra.mxu0 %vm277_vm2, %v276_v3  ;;  %v31_v8 = vld [vmem:[%s419_s5] sm:$0x1]  ;;  %vm36_vm4 = vcmask 97280   ;;  %s329_s0 = smov 104  }
   0x5   :  { %282 = vmatpush3.bf16.msk.msra.mxu1 %vm277_vm2, %v280_v6  ;;  %v35_v9 = vld [vmem:[%s34_s12] sm:$0x1]  ;;  %s330_s16 = smov 12   ;;  %vm227_vm5 = vcmask 90112   ;;  %s333_s17 = smov 92  }
   0x6   :  { %v30_v11 = vld [vmem:[%s418_s4] sm:$0x1]  ;;  %s331_s4 = smov 24   ;;  %s334_s18 = smov [#allocation4]  }
   0x7   :  { %266 = vmatmul.mubr.msk.f32.vlgmr.msra.gmra.mrb[0].mxu0 %vm36_vm4, %v31_v8  ;;  %v254_v18 = vld [vmem:[%s420_s6] ss:$0 sm:$0xff]  ;;  %s332_s6 = smov 116   ;;  %s240_s19 = sshll.u32 %s334_s18, 4  ;;  %s241_s19 = int_to_ptr.vmem [resolvable:$true] %s240_s19 }
   0x8   :  { %273 = vmatmul.mubr.msk.f32.vlgmr.msra.gmra.mrb[0].mxu1 %vm36_vm4, %v35_v9  ;;  %s301_s20 = scalar_lea.vmem %s241_s19, 32  ;;  %p306_p1 = scmp.lt.s32.totalorder %s241_s19, %s241_s19 }
   0x9   :  { %p302_p0 = scmp.ne.s32.totalorder %s241_s19, %s301_s20  ;;  %p307_p2 = scmp.lt.s32.totalorder %s301_s20, %s301_s20 }
   0xb   :  { %p308_p3 = por %p307_p2, %p306_p1 }
   0xd   :  { %p309_p4 = pnand %p308_p3, %p302_p0 }
  0xda   :  { %v110_v10 = vpop.f32.mrb[0].mxu0 }
  0xdb   :  { %v186_v12 = vpop.f32.mrb[0].mxu1  ;;  %v267_v13 = vpop.f32.mrb[1].mxu0 }
  0xdc   :  { %v187_v14 = vadd.f32 %v186_v12, %v110_v10  ;;  %v274_v15 = vpop.f32.mrb[1].mxu1 }
  0xde   :  { %v190_v16 = vadd.f32 %v187_v14, %v30_v11 }
  0xe0   :  { %293 = vtanh.f32 %v190_v16  ;;  %v253_v19 = vmul.f32 -1.442695, %v190_v16 }
  0xe2   :  { %295 = vpow2.f32 %v253_v19 }
  0xea   :  { %v294_v17 = vpop.eup %293 }
  0xeb   :  { %208 = vrot.lane.b32.xlu0 %v294_v17, %s329_s0 }
  0xec   :  { %v296_v20 = vpop.eup %295 }
  0xed   :  { %v194_v21 = vadd.f32 1.0, %v296_v20 }
  0xef   :  { %203 = vrot.lane.b32.xlu0 %v254_v18, %s330_s16  ;;  %297 = vrcp.f32 %v194_v21 }
  0xf9   :  { %v298_v22 = vpop.eup %297 }
 0x15d   :  { %v209_v23 = vpop.permute.xlu0 %208 }
 0x15e   :  { %v211_v24 = vmul.f32 %v298_v22, %v209_v23 }
 0x160   :  { %213 = vrot.lane.b32.xlu1 %v211_v24, %s330_s16 }
 0x161   :  { %v204_v25 = vpop.permute.xlu0 %203 }
 0x162   :  { %v206_v26 = vmul.f32 %v298_v22, %v204_v25 }
 0x1d2   :  { %v214_v27 = vpop.permute.xlu1 %213 }
 0x1d3   :  { %v216_v28 = vadd.f32 %v214_v27, %v206_v26 }
 0x1d5   :  { %299 = vtanh.f32 %v216_v28 }
 0x1df   :  { %v300_v29 = vpop.eup %299 }
 0x1e0   :  { %219 = vrot.lane.b32.xlu1 %v300_v29, %s331_s4 }
 0x1e4   :  { %230 = vrot.lane.b32.xlu1 %v216_v28, %s332_s6 }
 0x252   :  { %v220_v30 = vpop.permute.xlu1 %219 }
 0x253   :  { %v222_v31 = vmul.f32 %v298_v22, %v220_v30 }
 0x255   :  { %224 = vrot.lane.b32.xlu0 %v222_v31, %s333_s17 }
 0x256   :  { %v231_v32 = vpop.permute.xlu1 %230 }
 0x257   :  { %233 = vst.msk [vmem:[#allocation4 + $0x1] sm:$0x1] %vm227_vm5, %v231_v32 }
 0x2c7   :  { %v225_v33 = vpop.permute.xlu0 %224 }
 0x2c8   :  { %228 = vst.msk [vmem:[#allocation4] sm:$0x1] %vm227_vm5, %v225_v33 }
 0x2c9   :  { %312 = shalt.err (!%p309_p4)
}
 0x2ca   :  { %s313_s23 = scalar_lea.hbm %s421_s7, 32 }
 0x2cb   :  { %p314_p5 = scmp.ne.s32.totalorder %s421_s7, %s313_s23  ;;  %p317_p6 = scmp.lt.u32.totalorder %s313_s23, %s421_s7 }
 0x2cd   :  { %p319_p7 = pnand %p317_p6, %p314_p5 }
 0x2cf   :  { %322 = shalt.err (!%p319_p7)
}
 0x2d0   :  { %243 = dma.vmem_to_hbm [thread:$0]  %s241_s19, 32, %s421_s7, [#allocation5]  }
 0x2d1   :  { %323 = dma.done.wait [#allocation5], 32  }
 0x2d2   :  { %324 = vsyncadd [#allocation5], 4294967264 }
 0x2d3   :  { %247 = vsyncpa [#allocation5], 1 }

</bundles_post_ra>
